<compile_context>
chip_gen: v5e
topology: v5e:2x2
jax: 0.10.0
libtpu: 0.0.40
codegen_flags: <defaults>
</compile_context>

<pallas_src>
import jax
import jax.numpy as jnp
from jax.experimental import pallas as pl
from jax.experimental.pallas import tpu as pltpu


def linear_relu_kernel(x_ref, wb_ref, o_ref):
    in_f = wb_ref.shape[0] - 1        # static python int (2)

    x = x_ref[...]                    # (B, in_f)
    w = wb_ref[:in_f, :]              # (in_f, out_f)  -- static slice of fused slab
    bias = wb_ref[in_f:, :]           # (1, out_f)     -- last row of fused slab

    # One MXU matmul with an f32 accumulator; bias add + ReLU ride the VPU
    # in the same bundles.
    y = jnp.dot(x, w, preferred_element_type=jnp.float32) + bias
    o_ref[...] = jnp.maximum(y, 0.0).astype(o_ref.dtype)


def prepare_params(w, b):
    """One-time parameter prep (torch.nn.Linear layout -> fused kernel operand).

    w: (out_f, in_f), b: (out_f,)  ->  wb: (in_f + 1, out_f) = [W^T ; b].
    Call this ONCE at parameter-initialization time, not per forward call.
    """
    return jnp.concatenate([w.T, b[jnp.newaxis, :]], axis=0)


def my_model_forward(x, wb):
    """y = relu(x @ W^T + b), with wb = prepare_params(w, b).

    x: (B, in_f), wb: (in_f + 1, out_f)
    """
    B = x.shape[0]
    out_f = wb.shape[1]

    vmem = pltpu.MemorySpace.VMEM
    return pl.pallas_call(
        linear_relu_kernel,
        out_shape=jax.ShapeDtypeStruct((B, out_f), x.dtype),
        # No grid: one invocation; both (tiny) operands live whole in VMEM.
        in_specs=[
            pl.BlockSpec(memory_space=vmem),   # x
            pl.BlockSpec(memory_space=vmem),   # fused [W^T ; b]
        ],
        out_specs=pl.BlockSpec(memory_space=vmem),
    )(x, wb)


if __name__ == "__main__":
    key = jax.random.PRNGKey(0)
    kx, kw, kb = jax.random.split(key, 3)

    B, IN, OUT = 8, 2, 2
    x = jax.random.normal(kx, (B, IN), dtype=jnp.float32)

    # Deterministic parameter init (mimics PyTorch Linear's uniform(-1/sqrt(in), 1/sqrt(in))).
    bound = 1.0 / jnp.sqrt(jnp.float32(IN))
    w = jax.random.uniform(kw, (OUT, IN), minval=-bound, maxval=bound, dtype=jnp.float32)
    b = jax.random.uniform(kb, (OUT,), minval=-bound, maxval=bound, dtype=jnp.float32)

    # Parameter prep happens once, outside the forward path.
    wb = prepare_params(w, b)
    jax.block_until_ready(wb)

    y = my_model_forward(x, wb)
    jax.block_until_ready(y)

    # Reference check against plain JAX (torch.nn.Linear semantics).
    y_ref = jnp.maximum(x @ w.T + b, 0.0)
    assert jnp.allclose(y, y_ref, atol=1e-5), "mismatch vs reference"
    print("KERNEL_OK")
</pallas_src>

<mosaic_0001>
module attributes {stable_mosaic.version = 11 : i64} {
  func.func @linear_relu_kernel(%arg0: memref<8x2xf32, #tpu.memory_space<vmem>>, %arg1: memref<3x2xf32, #tpu.memory_space<vmem>>, %arg2: memref<8x2xf32, #tpu.memory_space<vmem>>) attributes {dimension_semantics = [], scalar_prefetch = 0 : i64, scratch_operands = 0 : i64, tpu.core_type = #tpu.core_type<tc>} {
    %c0 = arith.constant 0 : index
    %c0_0 = arith.constant 0 : index
    %0 = vector.load %arg0[%c0, %c0_0] : memref<8x2xf32, #tpu.memory_space<vmem>>, vector<8x2xf32>
    %c0_1 = arith.constant 0 : index
    %c0_2 = arith.constant 0 : index
    %1 = vector.load %arg1[%c0_1, %c0_2] : memref<3x2xf32, #tpu.memory_space<vmem>>, vector<2x2xf32>
    %c2 = arith.constant 2 : index
    %c0_3 = arith.constant 0 : index
    %2 = vector.load %arg1[%c2, %c0_3] : memref<3x2xf32, #tpu.memory_space<vmem>>, vector<1x2xf32>
    %cst = arith.constant dense<0.000000e+00> : vector<8x2xf32>
    %3 = tpu.matmul %0, %1, %cst {dimension_numbers = #tpu.dot_dimension_numbers<[1], [0], [0], [1], [0, 0, 1, 1], [], []>} : vector<8x2xf32>, vector<2x2xf32>, vector<8x2xf32> -> vector<8x2xf32>
    %4 = vector.broadcast %2 : vector<1x2xf32> to vector<8x2xf32>
    %5 = arith.addf %3, %4 : vector<8x2xf32>
    %cst_4 = arith.constant 0.000000e+00 : f32
    %6 = vector.broadcast %cst_4 : f32 to vector<8x2xf32>
    %7 = arith.maximumf %5, %6 : vector<8x2xf32>
    %c0_5 = arith.constant 0 : index
    %c0_6 = arith.constant 0 : index
    %8 = vector.load %arg2[%c0_5, %c0_6] : memref<8x2xf32, #tpu.memory_space<vmem>>, vector<8x2xf32>
    tpu.vector_store %arg2[%c0_5, %c0_6], %7 {strides = array<i32>} : memref<8x2xf32, #tpu.memory_space<vmem>>, vector<8x2xf32>,
    return
  }
}

</mosaic_0001>

<bundles_post_ra>
// kernel: tpu_custom_call.1
= control target key start
LH: loop header
LB: loop body
LE: loop exit
PB: predicated region body
PF: predicated region fallthrough
CT: control target
= control target key end

     0   :  { %vm19_vm0 = vcmask 1041408   ;;  %vm15_vm1 = vcmask 15360   ;;  %s79_s1 = inlined_call_operand.vmem [shape: f32[3,2], index: 1, kind: input, shape index: {}]   ;;  %s80_s0 = inlined_call_operand.vmem [shape: f32[8,2], index: 0, kind: input, shape index: {}]   ;;  %s81_s2 = inlined_call_operand.vmem [shape: f32[8,2], index: 2, kind: output, shape index: {}]  }
   0x1   :  { %v12_v0 = vld [vmem:[%s79_s1] sm:$0x3]  ;;  %v51_v2 = vld [vmem:[%s79_s1 + $0x2] ss:$0 sm:$0xff] }
   0x2   :  { %v11_v1 = vld [vmem:[%s80_s0] sm:$0xff]  ;;  %49 = vmatpush.msk.msra.mxu0 %vm19_vm0, %v12_v0 }
   0x3   :  { %50 = vmatmul.msk.f32.vlgmr.msra.gmra.mxu0 %vm15_vm1, %v11_v1 }
  0x80   :  { %v40_v3 = vpop.f32.mrf.mxu0 }
  0x81   :  { %v41_v4 = vadd.f32 %v51_v2, %v40_v3 }
  0x83   :  { %v43_v5 = vmax.f32 %v41_v4, 0.0 }
  0x85   :  { %44 = vst.msk [vmem:[%s81_s2] sm:$0xff] %vm15_vm1, %v43_v5 }

</bundles_post_ra>
